<compile_context>
chip_gen: v6e
topology: v6e:2x2x1
jax: 0.10.0
libtpu: 0.0.40
codegen_flags: <defaults>
</compile_context>

<pallas_src>
import jax
import jax.numpy as jnp
from jax import lax
from jax.experimental import pallas as pl
from jax.experimental.pallas import tpu as pltpu


def _valuenet_kernel(x_ref, w1_ref, b1w2_ref, b2_ref, o_ref):
    # x_ref   : (TB, D_in) f32  -- native batch-major tile
    # w1_ref  : (H, D_in)       -- PyTorch fc1.weight layout (resident)
    # b1w2_ref: (H, 2)          -- col 0 = b1, col 1 = w2 (resident)
    # b2_ref  : (1,) in SMEM    -- fc2.bias scalar
    # o_ref   : (1, TB)         -- lane-dense output tile
    # fc1 on the MXU, oriented (H, TB): contract D_in of both operands so no
    # wrapper-side transpose of x is needed (operand transpose lands on XLU).
    h = lax.dot_general(
        w1_ref[...], x_ref[...],
        dimension_numbers=(((1,), (1,)), ((), ())),
        preferred_element_type=jnp.float32)                 # (H, TB)
    b1 = b1w2_ref[:, 0:1]                                   # (H, 1)
    w2 = b1w2_ref[:, 1:2]                                   # (H, 1)
    h = jnp.maximum(h + b1, 0.0)                            # VPU bias + relu
    # fc2 as VPU multiply + sublane (XLU) reduce -- no N=1 MXU matmul.
    v = jnp.sum(h * w2, axis=0, keepdims=True)              # (1, TB)
    o_ref[...] = v + b2_ref[0]                              # SMEM scalar bias


def value_net_forward(x, w1, b1, w2, b2, *, block_b=None):
    """ValueNet forward.

    x : [B, D_in] float32
    w1: [H, D_in] (fc1.weight), b1: [H] (fc1.bias)
    w2: [1, H]   (fc2.weight), b2: [1] (fc2.bias)
    returns [B, 1] float32
    """
    B, D_in = x.shape
    H = w1.shape[0]

    if block_b is None:
        # Big enough that the per-step x DMA (~1 MiB f32 at D_in=16) dwarfs
        # the ~0.35 us fixed grid-step overhead, small enough (~7 MiB total
        # VMEM incl. the (H, TB) f32 intermediate + double-buffered x) to fit
        # the default scoped VMEM on v5e/v6e/v7x.  Clamp to next_pow2(B/2) so
        # large batches always produce >= 2 grid steps (v7x megacore).
        cap = 16384
        block_b = int(min(cap, max(128, pl.next_power_of_2(pl.cdiv(B, 2)))))
    n_blocks = int(pl.cdiv(B, block_b))
    b_pad = n_blocks * block_b

    # Native layout; contiguous tail pad along the batch axis only if needed.
    xf = x.astype(jnp.float32)                      # (B, D_in)
    if b_pad != B:
        xf = jnp.pad(xf, ((0, b_pad - B), (0, 0)))  # (b_pad, D_in)

    w1c = w1.astype(jnp.float32)                    # (H, D_in)
    # Merge b1 and w2 into one resident (H, 2) tile; b2 as a flat SMEM scalar.
    b1w2 = jnp.concatenate(
        [b1.reshape(H, 1), w2.reshape(H, 1)], axis=1).astype(jnp.float32)
    b2c = b2.reshape(1).astype(jnp.float32)         # (1,) -> SMEM scalar

    out = pl.pallas_call(
        _valuenet_kernel,
        out_shape=jax.ShapeDtypeStruct((1, b_pad), jnp.float32),
        grid=(n_blocks,),
        in_specs=[
            pl.BlockSpec((block_b, D_in), lambda i: (i, 0)),       # x tile
            pl.BlockSpec((H, D_in), lambda i: (0, 0)),             # W1 (resident)
            pl.BlockSpec((H, 2), lambda i: (0, 0)),                # [b1 | w2]
            pl.BlockSpec(memory_space=pltpu.MemorySpace.SMEM),     # b2 scalar
        ],
        out_specs=pl.BlockSpec((1, block_b), lambda i: (0, i)),
        compiler_params=pltpu.CompilerParams(
            dimension_semantics=("parallel",),
            vmem_limit_bytes=32 * 1024 * 1024,
        ),
    )(xf, w1c, b1w2, b2c)

    # Padded (zero) batch rows yield w2.relu(b1)+b2 in padded lanes; slice off.
    return out[0, :B].reshape(B, 1)


def init_params(key, input_size, hidden_layer_size=64):
    """Deterministic init mimicking torch.nn.Linear defaults, PyTorch layouts."""
    k1, k2, k3, k4 = jax.random.split(key, 4)
    bound1 = 1.0 / jnp.sqrt(jnp.float32(input_size))
    bound2 = 1.0 / jnp.sqrt(jnp.float32(hidden_layer_size))
    w1 = jax.random.uniform(k1, (hidden_layer_size, input_size),
                            jnp.float32, -bound1, bound1)   # fc1.weight
    b1 = jax.random.uniform(k2, (hidden_layer_size,),
                            jnp.float32, -bound1, bound1)   # fc1.bias
    w2 = jax.random.uniform(k3, (1, hidden_layer_size),
                            jnp.float32, -bound2, bound2)   # fc2.weight
    b2 = jax.random.uniform(k4, (1,), jnp.float32, -bound2, bound2)  # fc2.bias
    return w1, b1, w2, b2


def _reference(x, w1, b1, w2, b2):
    # Pure-JAX reference matching torch.nn.Linear semantics.
    h = jnp.maximum(x @ w1.T + b1[None, :], 0.0)
    return h @ w2.T + b2[None, :]


if __name__ == "__main__":
    key = jax.random.PRNGKey(0)
    kx, kp = jax.random.split(key)

    # TODO(synk): torch.from_numpy(x).float() host conversion has no Pallas
    # equivalent; inputs are passed directly as float32 device arrays.

    B, D_in, H = 8, 16, 64  # small RL-style shapes (input_size=16, hidden=64)
    x = jax.random.normal(kx, (B, D_in), dtype=jnp.float32)
    w1, b1, w2, b2 = init_params(kp, D_in, H)

    out = jax.block_until_ready(value_net_forward(x, w1, b1, w2, b2))
    ref = _reference(x, w1, b1, w2, b2)
    assert out.shape == (B, 1)
    assert jnp.allclose(out, ref, atol=1e-4, rtol=1e-4)

    # Multi-step grid + ragged-tail padding path (explicit small tile).
    B2 = 300
    x2 = jax.random.normal(jax.random.PRNGKey(1), (B2, D_in), dtype=jnp.float32)
    out2 = jax.block_until_ready(
        value_net_forward(x2, w1, b1, w2, b2, block_b=128))
    ref2 = _reference(x2, w1, b1, w2, b2)
    assert out2.shape == (B2, 1)
    assert jnp.allclose(out2, ref2, atol=1e-4, rtol=1e-4)

    # Default tile selection at a larger batch: >= 2 grid steps (megacore path).
    B3 = 3000
    x3 = jax.random.normal(jax.random.PRNGKey(2), (B3, D_in), dtype=jnp.float32)
    out3 = jax.block_until_ready(value_net_forward(x3, w1, b1, w2, b2))
    ref3 = _reference(x3, w1, b1, w2, b2)
    assert out3.shape == (B3, 1)
    assert jnp.allclose(out3, ref3, atol=1e-4, rtol=1e-4)

    print("KERNEL_OK")
</pallas_src>

<mosaic_0001>
module attributes {stable_mosaic.version = 11 : i64} {
  func.func @_valuenet_kernel(%arg0: i32, %arg1: memref<128x16xf32, #tpu.memory_space<vmem>>, %arg2: memref<64x16xf32, #tpu.memory_space<vmem>>, %arg3: memref<64x2xf32, #tpu.memory_space<vmem>>, %arg4: memref<1xf32, #tpu.memory_space<smem>>, %arg5: memref<1x128xf32, #tpu.memory_space<vmem>>) attributes {dimension_semantics = [#tpu.dimension_semantics<parallel>], iteration_bounds = array<i64: 1>, scalar_prefetch = 0 : i64, scratch_operands = 0 : i64, tpu.core_type = #tpu.core_type<tc>, window_params = [{transform_indices = @transform_0, window_bounds = array<i64: 128, 16>}, {pipeline_mode = #tpu.pipeline_mode<synchronous>, transform_indices = @transform_1, window_bounds = array<i64: 64, 16>}, {pipeline_mode = #tpu.pipeline_mode<synchronous>, transform_indices = @transform_2, window_bounds = array<i64: 64, 2>}, {transform_indices = @transform_3, window_bounds = array<i64: 1>}, {transform_indices = @transform_4, window_bounds = array<i64: 1, 128>}]} {
    %c0 = arith.constant 0 : index
    %c0_0 = arith.constant 0 : index
    %0 = vector.load %arg2[%c0, %c0_0] : memref<64x16xf32, #tpu.memory_space<vmem>>, vector<64x16xf32>
    %c0_1 = arith.constant 0 : index
    %c0_2 = arith.constant 0 : index
    %1 = vector.load %arg1[%c0_1, %c0_2] : memref<128x16xf32, #tpu.memory_space<vmem>>, vector<128x16xf32>
    %cst = arith.constant dense<0.000000e+00> : vector<64x128xf32>
    %2 = tpu.matmul %0, %1, %cst {dimension_numbers = #tpu.dot_dimension_numbers<[1], [1], [0], [0], [0, 0, 1, 0], [], []>} : vector<64x16xf32>, vector<128x16xf32>, vector<64x128xf32> -> vector<64x128xf32>
    %c0_3 = arith.constant 0 : index
    %c0_4 = arith.constant 0 : index
    %3 = vector.load %arg3[%c0_3, %c0_4] : memref<64x2xf32, #tpu.memory_space<vmem>>, vector<64x1xf32>
    %c0_5 = arith.constant 0 : index
    %c1 = arith.constant 1 : index
    %4 = vector.load %arg3[%c0_5, %c1] : memref<64x2xf32, #tpu.memory_space<vmem>>, vector<64x1xf32>
    %5 = vector.broadcast %3 : vector<64x1xf32> to vector<64x128xf32>
    %6 = arith.addf %2, %5 : vector<64x128xf32>
    %cst_6 = arith.constant 0.000000e+00 : f32
    %7 = vector.broadcast %cst_6 : f32 to vector<64x128xf32>
    %8 = arith.maximumf %6, %7 : vector<64x128xf32>
    %9 = vector.broadcast %4 : vector<64x1xf32> to vector<64x128xf32>
    %10 = arith.mulf %8, %9 : vector<64x128xf32>
    %cst_7 = arith.constant dense<0.000000e+00> : vector<128xf32>
    %11 = vector.multi_reduction <add>, %10, %cst_7 [0] : vector<64x128xf32> to vector<128xf32>
    %12 = vector.shape_cast %11 : vector<128xf32> to vector<1x128xf32>
    %c0_8 = arith.constant 0 : index
    %13 = memref.load %arg4[%c0_8] : memref<1xf32, #tpu.memory_space<smem>>
    %14 = vector.broadcast %13 : f32 to vector<1x128xf32>
    %15 = arith.addf %12, %14 : vector<1x128xf32>
    %c0_9 = arith.constant 0 : index
    %c0_10 = arith.constant 0 : index
    %16 = vector.load %arg5[%c0_9, %c0_10] : memref<1x128xf32, #tpu.memory_space<vmem>>, vector<1x128xf32>
    tpu.vector_store %arg5[%c0_9, %c0_10], %15 {strides = array<i32>} : memref<1x128xf32, #tpu.memory_space<vmem>>, vector<1x128xf32>,
    return
  }
  func.func @transform_0(%arg0: i32) -> (i32, i32) {
    %c0_i32 = arith.constant 0 : i32
    %c0_i32_0 = arith.constant 0 : i32
    return %arg0, %c0_i32 : i32, i32
  }
  func.func @transform_1(%arg0: i32) -> (i32, i32) {
    %c0_i32 = arith.constant 0 : i32
    %c0_i32_0 = arith.constant 0 : i32
    %c0_i32_1 = arith.constant 0 : i32
    return %c0_i32, %c0_i32_0 : i32, i32
  }
  func.func @transform_2(%arg0: i32) -> (i32, i32) {
    %c0_i32 = arith.constant 0 : i32
    %c0_i32_0 = arith.constant 0 : i32
    %c0_i32_1 = arith.constant 0 : i32
    return %c0_i32, %c0_i32_0 : i32, i32
  }
  func.func @transform_3(%arg0: i32) -> i32 {
    %c0_i32 = arith.constant 0 : i32
    %c0_i32_0 = arith.constant 0 : i32
    return %c0_i32 : i32
  }
  func.func @transform_4(%arg0: i32) -> (i32, i32) {
    %c0_i32 = arith.constant 0 : i32
    %c0_i32_0 = arith.constant 0 : i32
    return %c0_i32, %arg0 : i32, i32
  }
}

</mosaic_0001>

<bundles_post_ra>
// kernel: tpu_custom_call.1
= control target key start
LH: loop header
LB: loop body
LE: loop exit
PB: predicated region body
PF: predicated region fallthrough
CT: control target
= control target key end

     0   :  { %vm91_vm0 = vcmask 130048   ;;  %v503_v3 = vmov 0   ;;  %s705_s0 = inlined_call_operand.vmem [shape: f32[128,16], index: 0, kind: input, shape index: {}]   ;;  %s706_s1 = inlined_call_operand.vmem [shape: f32[64,16], index: 1, kind: input, shape index: {}]   ;;  %s707_s2 = inlined_call_operand.vmem [shape: f32[64,2], index: 2, kind: input, shape index: {}]   ;;  %s708_s3 = inlined_call_operand.<no memory space> [shape: f32[1], index: 3, kind: input, shape index: {}]   ;;  %s709_s4 = inlined_call_operand.hbm [shape: f32[1,128], index: 4, kind: output, shape index: {}]  }
   0x1   :  { %v42_v0 = vld [vmem:[%s705_s0 + $0x78] sm:$0xff]  ;;  %v41_v1 = vld [vmem:[%s705_s0 + $0x70] sm:$0xff]  ;;  %v40_v2 = vld [vmem:[%s705_s0 + $0x68] sm:$0xff]  ;;  %475 = vset.pattern.permute.xlu0 %v503_v3  ;;  %476 = vset.pattern.permute.xlu1 %v503_v3 }
   0x2   :  { %396 = vmatprep.subr.msk.mxu0 %vm91_vm0, %v42_v0  ;;  %440 = vmatprep.subr.msk.mxu1 %vm91_vm0, %v42_v0  ;;  %v19_v4 = vld [vmem:[%s706_s1] sm:$0xff]  ;;  %v45_v8 = vld [vmem:[%s707_s2 + $0x10] sm:$0xff]  ;;  %v44_v9 = vld [vmem:[%s707_s2 + $0x8] sm:$0xff] }
   0x3   :  { %397 = vmatpush3.xpose.msk.msra.mxu0 %vm91_vm0, %v42_v0  ;;  %456 = vmatpush3.xpose.msk.msra.mxu1 %vm91_vm0, %v42_v0  ;;  %v23_v5 = vld [vmem:[%s706_s1 + $0x20] sm:$0xff]  ;;  %v46_v10 = vld [vmem:[%s707_s2 + $0x18] sm:$0xff] }
   0x4   :  { %398 = vmatprep.subr.msk.mxu0 %vm91_vm0, %v41_v1  ;;  %441 = vmatprep.subr.msk.mxu1 %vm91_vm0, %v41_v1  ;;  %v39_v6 = vld [vmem:[%s705_s0 + $0x60] sm:$0xff] }
   0x5   :  { %428 = vmatprep.mubr.msk.f32.mxu0 %vm91_vm0, %v19_v4  ;;  %434 = vmatprep.mubr.msk.f32.mxu1 %vm91_vm0, %v23_v5  ;;  %v43_v7 = vld [vmem:[%s707_s2] sm:$0xff] }
   0x6   :  { %53 = vperm.xlu0 %475, %v43_v7   ;;  %63 = vperm.xlu1 %476, %v45_v8  }
   0x7   :  { %399 = vmatpush3.xpose.msk.msra.mxu0 %vm91_vm0, %v41_v1  ;;  %457 = vmatpush3.xpose.msk.msra.mxu1 %vm91_vm0, %v41_v1 }
   0x8   :  { %400 = vmatprep.subr.msk.mxu0 %vm91_vm0, %v40_v2  ;;  %442 = vmatprep.subr.msk.mxu1 %vm91_vm0, %v40_v2 }
   0xb   :  { %401 = vmatpush3.xpose.msk.msra.mxu0 %vm91_vm0, %v40_v2  ;;  %458 = vmatpush3.xpose.msk.msra.mxu1 %vm91_vm0, %v40_v2 }
   0xc   :  { %10 = vsyncpa [#allocation4], 0  ;;  %402 = vmatprep.subr.msk.mxu0 %vm91_vm0, %v39_v6  ;;  %443 = vmatprep.subr.msk.mxu1 %vm91_vm0, %v39_v6  ;;  %v38_v11 = vld [vmem:[%s705_s0 + $0x58] sm:$0xff]  ;;  %v37_v12 = vld [vmem:[%s705_s0 + $0x50] sm:$0xff]  ;;  %v504_v13 = vmov 1   ;;  %s505_s26 = smov [#allocation3]  }
   0xd   :  { %58 = vperm.xlu0 %475, %v44_v9   ;;  %68 = vperm.xlu1 %476, %v46_v10   ;;  %v36_v14 = vld [vmem:[%s705_s0 + $0x48] sm:$0xff]  ;;  %v47_v15 = vld [vmem:[%s707_s2 + $0x20] sm:$0xff]  ;;  %v34_v18 = vld [vmem:[%s705_s0 + $0x38] sm:$0xff]  ;;  %s340_s27 = sshll.u32 %s505_s26, 4  ;;  %s341_s27 = int_to_ptr.vmem [resolvable:$true] %s340_s27 }
   0xe   :  { %v35_v16 = vld [vmem:[%s705_s0 + $0x40] sm:$0xff]  ;;  %v48_v17 = vld [vmem:[%s707_s2 + $0x28] sm:$0xff]  ;;  %v49_v19 = vld [vmem:[%s707_s2 + $0x30] sm:$0xff]  ;;  %s481_s28 = scalar_lea.vmem %s341_s27, 16  ;;  %s485_s29 = scalar_lea.vmem %s341_s27, 32 }
   0xf   :  { %403 = vmatpush3.xpose.msk.msra.mxu0 %vm91_vm0, %v39_v6  ;;  %459 = vmatpush3.xpose.msk.msra.mxu1 %vm91_vm0, %v39_v6  ;;  %v33_v20 = vld [vmem:[%s705_s0 + $0x30] sm:$0xff]  ;;  %v50_v21 = vld [vmem:[%s707_s2 + $0x38] sm:$0xff]  ;;  %v32_v22 = vld [vmem:[%s705_s0 + $0x28] sm:$0xff]  ;;  %p482_p0 = scmp.ne.s32.totalorder %s341_s27, %s481_s28  ;;  %p486_p1 = scmp.lt.s32.totalorder %s341_s27, %s341_s27 }
  0x10   :  { %404 = vmatprep.subr.msk.mxu0 %vm91_vm0, %v38_v11  ;;  %444 = vmatprep.subr.msk.mxu1 %vm91_vm0, %v38_v11  ;;  %v31_v23 = vld [vmem:[%s705_s0 + $0x20] sm:$0xff]  ;;  %v30_v24 = vld [vmem:[%s705_s0 + $0x18] sm:$0xff]  ;;  %v29_v25 = vld [vmem:[%s705_s0 + $0x10] sm:$0xff]  ;;  %p487_p2 = scmp.lt.s32.totalorder %s485_s29, %s481_s28 }
  0x11   :  { %477 = vset.pattern.permute.xlu0 %v504_v13  ;;  %478 = vset.pattern.permute.xlu1 %v504_v13  ;;  %v28_v26 = vld [vmem:[%s705_s0 + $0x8] sm:$0xff]  ;;  %v27_v27 = vld [vmem:[%s705_s0] sm:$0xff]  ;;  %v21_v30 = vld [vmem:[%s706_s1 + $0x10] sm:$0xff] }
  0x12   :  { %278 = vperm.xlu0 %477, %v43_v7   ;;  %282 = vperm.xlu1 %478, %v44_v9   ;;  %v20_v28 = vld [vmem:[%s706_s1 + $0x8] sm:$0xff]  ;;  %v25_v31 = vld [vmem:[%s706_s1 + $0x30] sm:$0xff]  ;;  %v22_v32 = vld [vmem:[%s706_s1 + $0x18] sm:$0xff]  ;;  %p488_p3 = por %p487_p2, %p486_p1 }
  0x13   :  { %405 = vmatpush3.xpose.msk.msra.mxu0 %vm91_vm0, %v38_v11  ;;  %460 = vmatpush3.xpose.msk.msra.mxu1 %vm91_vm0, %v38_v11  ;;  %v24_v29 = vld [vmem:[%s706_s1 + $0x28] sm:$0xff]  ;;  %v26_v33 = vld [vmem:[%s706_s1 + $0x38] sm:$0xff] }
  0x14   :  { %406 = vmatprep.subr.msk.mxu0 %vm91_vm0, %v37_v12  ;;  %445 = vmatprep.subr.msk.mxu1 %vm91_vm0, %v37_v12  ;;  %p489_p4 = pnand %p488_p3, %p482_p0 }
  0x16   :  { %286 = vperm.xlu0 %477, %v45_v8   ;;  %479 = vset.pattern.permute.xlu1 %v503_v3 }
  0x17   :  { %407 = vmatpush3.xpose.msk.msra.mxu0 %vm91_vm0, %v37_v12  ;;  %461 = vmatpush3.xpose.msk.msra.mxu1 %vm91_vm0, %v37_v12 }
  0x18   :  { %408 = vmatprep.subr.msk.mxu0 %vm91_vm0, %v36_v14  ;;  %446 = vmatprep.subr.msk.mxu1 %vm91_vm0, %v36_v14 }
  0x19   :  { %73 = vperm.xlu1 %479, %v47_v15  }
  0x1a   :  { %290 = vperm.xlu0 %477, %v46_v10  }
  0x1b   :  { %409 = vmatpush3.xpose.msk.msra.mxu0 %vm91_vm0, %v36_v14  ;;  %462 = vmatpush3.xpose.msk.msra.mxu1 %vm91_vm0, %v36_v14 }
  0x1c   :  { %410 = vmatprep.subr.msk.mxu0 %vm91_vm0, %v35_v16  ;;  %447 = vmatprep.subr.msk.mxu1 %vm91_vm0, %v35_v16 }
  0x1d   :  { %78 = vperm.xlu1 %479, %v48_v17  }
  0x1e   :  { %294 = vperm.xlu0 %477, %v47_v15  }
  0x1f   :  { %411 = vmatpush3.xpose.msk.msra.mxu0 %vm91_vm0, %v35_v16  ;;  %463 = vmatpush3.xpose.msk.msra.mxu1 %vm91_vm0, %v35_v16 }
  0x20   :  { %412 = vmatprep.subr.msk.mxu0 %vm91_vm0, %v34_v18  ;;  %448 = vmatprep.subr.msk.mxu1 %vm91_vm0, %v34_v18 }
  0x21   :  { %83 = vperm.xlu1 %479, %v49_v19  }
  0x22   :  { %298 = vperm.xlu0 %477, %v48_v17  }
  0x23   :  { %413 = vmatpush3.xpose.msk.msra.mxu0 %vm91_vm0, %v34_v18  ;;  %464 = vmatpush3.xpose.msk.msra.mxu1 %vm91_vm0, %v34_v18 }
  0x24   :  { %414 = vmatprep.subr.msk.mxu0 %vm91_vm0, %v33_v20  ;;  %449 = vmatprep.subr.msk.mxu1 %vm91_vm0, %v33_v20 }
  0x25   :  { %88 = vperm.xlu1 %479, %v50_v21  }
  0x26   :  { %306 = vperm.xlu0 %477, %v50_v21  }
  0x27   :  { %415 = vmatpush3.xpose.msk.msra.mxu0 %vm91_vm0, %v33_v20  ;;  %465 = vmatpush3.xpose.msk.msra.mxu1 %vm91_vm0, %v33_v20 }
  0x28   :  { %416 = vmatprep.subr.msk.mxu0 %vm91_vm0, %v32_v22  ;;  %450 = vmatprep.subr.msk.mxu1 %vm91_vm0, %v32_v22 }
  0x29   :  { %480 = vset.pattern.permute.xlu1 %v504_v13 }
  0x2a   :  { %302 = vperm.xlu1 %480, %v49_v19  }
  0x2b   :  { %417 = vmatpush3.xpose.msk.msra.mxu0 %vm91_vm0, %v32_v22  ;;  %466 = vmatpush3.xpose.msk.msra.mxu1 %vm91_vm0, %v32_v22 }
  0x2c   :  { %418 = vmatprep.subr.msk.mxu0 %vm91_vm0, %v31_v23  ;;  %451 = vmatprep.subr.msk.mxu1 %vm91_vm0, %v31_v23 }
  0x2f   :  { %419 = vmatpush3.xpose.msk.msra.mxu0 %vm91_vm0, %v31_v23  ;;  %467 = vmatpush3.xpose.msk.msra.mxu1 %vm91_vm0, %v31_v23 }
  0x30   :  { %420 = vmatprep.subr.msk.mxu0 %vm91_vm0, %v30_v24  ;;  %452 = vmatprep.subr.msk.mxu1 %vm91_vm0, %v30_v24 }
  0x33   :  { %421 = vmatpush3.xpose.msk.msra.mxu0 %vm91_vm0, %v30_v24  ;;  %468 = vmatpush3.xpose.msk.msra.mxu1 %vm91_vm0, %v30_v24 }
  0x34   :  { %422 = vmatprep.subr.msk.mxu0 %vm91_vm0, %v29_v25  ;;  %453 = vmatprep.subr.msk.mxu1 %vm91_vm0, %v29_v25 }
  0x37   :  { %423 = vmatpush3.xpose.msk.msra.mxu0 %vm91_vm0, %v29_v25  ;;  %469 = vmatpush3.xpose.msk.msra.mxu1 %vm91_vm0, %v29_v25 }
  0x38   :  { %424 = vmatprep.subr.msk.mxu0 %vm91_vm0, %v28_v26  ;;  %454 = vmatprep.subr.msk.mxu1 %vm91_vm0, %v28_v26 }
  0x3b   :  { %425 = vmatpush3.xpose.msk.msra.mxu0 %vm91_vm0, %v28_v26  ;;  %470 = vmatpush3.xpose.msk.msra.mxu1 %vm91_vm0, %v28_v26 }
  0x3c   :  { %426 = vmatprep.subr.msk.mxu0 %vm91_vm0, %v27_v27  ;;  %455 = vmatprep.subr.msk.mxu1 %vm91_vm0, %v27_v27 }
  0x3f   :  { %427 = vmatpush3.xpose.msk.msra.mxu0 %vm91_vm0, %v27_v27  ;;  %471 = vmatpush3.xpose.msk.msra.mxu1 %vm91_vm0, %v27_v27 }
  0x42   :  { %429 = vmatmul.mubr.msk.f32.vlgmr.msra.gmra.mxu0 %vm91_vm0, %v20_v28  ;;  %435 = vmatmul.mubr.msk.f32.vlgmr.msra.gmra.mxu1 %vm91_vm0, %v24_v29 }
  0x43   :  { %431 = vmatprep.mubr.msk.f32.mxu0 %vm91_vm0, %v21_v30  ;;  %437 = vmatprep.mubr.msk.f32.mxu1 %vm91_vm0, %v25_v31  ;;  %v331_v30 = vstv %s708_s3 }
  0x46   :  { %432 = vmatmul.mubr.msk.f32.gmra.mxu0 %vm91_vm0, %v22_v32  ;;  %438 = vmatmul.mubr.msk.f32.gmra.mxu1 %vm91_vm0, %v26_v33 }
  0x81   :  { %v64_v34 = vpop.permute.xlu1 %63  ;;  %v54_v35 = vpop.permute.xlu0 %53 }
  0x88   :  { %v69_v36 = vpop.permute.xlu1 %68  ;;  %v59_v37 = vpop.permute.xlu0 %58 }
  0x8d   :  { %v283_v38 = vpop.permute.xlu1 %282  ;;  %v279_v39 = vpop.permute.xlu0 %278 }
  0x91   :  { %v287_v41 = vpop.permute.xlu0 %286 }
  0x94   :  { %v74_v40 = vpop.permute.xlu1 %73 }
  0x95   :  { %v291_v45 = vpop.permute.xlu0 %290 }
  0x98   :  { %v79_v42 = vpop.permute.xlu1 %78 }
  0x99   :  { %v295_v60 = vpop.permute.xlu0 %294 }
  0x9c   :  { %v84_v54 = vpop.permute.xlu1 %83 }
  0x9d   :  { %v299_v11 = vpop.permute.xlu0 %298 }
  0xa0   :  { %v89_v6 = vpop.permute.xlu1 %88 }
  0xa1   :  { %v307_v21 = vpop.permute.xlu0 %306 }
  0xa5   :  { %v303_v15 = vpop.permute.xlu1 %302 }
 0x102   :  { %v430_v43 = vpop.f32.mrf.mxu0  ;;  %v436_v44 = vpop.f32.mrf.mxu1 }
 0x103   :  { %v236_v46 = vadd.f32 %v430_v43, %v59_v37  ;;  %v256_v63 = vadd.f32 %v436_v44, %v79_v42 }
 0x104   :  { %v230_v47 = vpop.f32.mrf.mxu0  ;;  %v250_v48 = vpop.f32.mrf.mxu1 }
 0x105   :  { %v231_v49 = vadd.f32 %v230_v47, %v54_v35  ;;  %v270_v52 = vmax.f32 %v236_v46, 0.0  ;;  %v251_v58 = vadd.f32 %v250_v48, %v74_v40  ;;  %v274_v7 = vmax.f32 %v256_v63, 0.0 }
 0x106   :  { %v433_v50 = vpop.f32.mrf.mxu0  ;;  %v439_v51 = vpop.f32.mrf.mxu1 }
 0x107   :  { %v269_v53 = vmax.f32 %v231_v49, 0.0  ;;  %v246_v55 = vadd.f32 %v433_v50, %v69_v36  ;;  %v310_v62 = vmul.f32 %v283_v38, %v270_v52  ;;  %v273_v3 = vmax.f32 %v251_v58, 0.0 }
 0x108   :  { %v240_v56 = vpop.f32.mrf.mxu0  ;;  %v260_v61 = vpop.f32.mrf.mxu1  ;;  %v266_v9 = vadd.f32 %v439_v51, %v89_v6  ;;  %v314_v16 = vmul.f32 %v299_v11, %v274_v7 }
 0x109   :  { %v309_v57 = vmul.f32 %v279_v39, %v269_v53  ;;  %v241_v59 = vadd.f32 %v240_v56, %v64_v34  ;;  %v272_v0 = vmax.f32 %v246_v55, 0.0  ;;  %v261_v5 = vadd.f32 %v260_v61, %v84_v54 }
 0x10a   :  { %v313_v12 = vmul.f32 %v295_v60, %v273_v3  ;;  %v276_v17 = vmax.f32 %v266_v9, 0.0 }
 0x10b   :  { %v271_v1 = vmax.f32 %v241_v59, 0.0  ;;  %v317_v2 = vadd.f32 %v310_v62, %v309_v57  ;;  %v312_v8 = vmul.f32 %v291_v45, %v272_v0  ;;  %v275_v14 = vmax.f32 %v261_v5, 0.0 }
 0x10c   :  { %v316_v22 = vmul.f32 %v307_v21, %v276_v17 }
 0x10d   :  { %v311_v4 = vmul.f32 %v287_v41, %v271_v1  ;;  %v315_v19 = vmul.f32 %v303_v15, %v275_v14 }
 0x10f   :  { %v318_v10 = vadd.f32 %v317_v2, %v311_v4 }
 0x111   :  { %v319_v13 = vadd.f32 %v318_v10, %v312_v8 }
 0x113   :  { %v320_v18 = vadd.f32 %v319_v13, %v313_v12 }
 0x115   :  { %v321_v20 = vadd.f32 %v320_v18, %v314_v16 }
 0x117   :  { %v322_v23 = vadd.f32 %v321_v20, %v315_v19 }
 0x119   :  { %v323_v24 = vadd.f32 %v322_v23, %v316_v22 }
 0x11b   :  { %v324_v25 = vrot.slane %v323_v24, 4 }
 0x11d   :  { %v325_v26 = vadd.f32 %v324_v25, %v323_v24 }
 0x11f   :  { %v326_v27 = vrot.slane %v325_v26, 2 }
 0x121   :  { %v327_v28 = vadd.f32 %v326_v27, %v325_v26 }
 0x123   :  { %v328_v29 = vrot.slane %v327_v28, 1 }
 0x125   :  { %v329_v31 = vadd.f32 %v328_v29, %v327_v28 }
 0x127   :  { %v332_v32 = vadd.f32 %v331_v30, %v329_v31 }
 0x129   :  { %333 = vst [vmem:[#allocation3] sm:$0x1] %v332_v32 }
 0x12a   :  { %492 = shalt.err (!%p489_p4)
}
 0x12b   :  { %343 = dma.vmem_to_hbm [thread:$0]  %s341_s27, 16, %s709_s4, [#allocation4]  }
 0x12c   :  { %501 = dma.done.wait [#allocation4], 16  }
 0x12d   :  { %502 = vsyncadd [#allocation4], 4294967280 }
 0x12e   :  { %347 = vsyncpa [#allocation4], 1 }

</bundles_post_ra>
